<compile_context>
chip_gen: v7x
topology: tpu7x:2x2x1
jax: 0.10.0
libtpu: 0.0.40
codegen_flags: <defaults>
</compile_context>

<pallas_src>
import jax
import jax.numpy as jnp
from jax import lax
from jax.experimental import pallas as pl
from jax.experimental.pallas import tpu as pltpu

_EPS = 1e-5


def _conv_stats_kernel(patches_ref, w_ref, sum_ref, sumsq_ref):
    """Pass 1: per-tile partial channel sum / sum-of-squares of the conv output.

    patches: (TM, CKK) bf16   w: (CKK, P) bf16 (resident)
    sum/sumsq: (1, 1, P) f32  -- one partial row per grid tile (fully parallel grid).
    """
    conv = jnp.dot(patches_ref[...], w_ref[...],
                   preferred_element_type=jnp.float32)          # MXU, f32 accumulate
    sum_ref[...] = jnp.sum(conv, axis=0, keepdims=True).reshape(sum_ref.shape)
    sumsq_ref[...] = jnp.sum(conv * conv, axis=0,
                             keepdims=True).reshape(sumsq_ref.shape)


def _conv_bn_relu_kernel(patches_ref, w_ref, scale_ref, shift_ref, out_ref):
    """Pass 2: recompute the conv tile and fuse BN (scale/shift) + ReLU.

    Re-reading the bf16 patches (2 B/elem) is cheaper than round-tripping a f32 (or
    even bf16) conv intermediate through HBM.
    """
    conv = jnp.dot(patches_ref[...], w_ref[...],
                   preferred_element_type=jnp.float32)
    out_ref[...] = jnp.maximum(conv * scale_ref[...] + shift_ref[...], 0.0)


def convblock_forward(x, w, b, gamma, beta, *, padding=0, dilation=1, block_m=2048):
    """x: (N, C, H, W) f32. w: (P, C, K, K). b/gamma/beta: (P,). stride=1.

    `b` is accepted for API parity but unused: a per-channel conv bias is cancelled
    exactly by the batch-mean subtraction of training-mode BatchNorm.
    """
    del b
    assert dilation == 1, "dilation=1 only"   # TODO(synk): dilated taps in im2col
    N, C, H, W = x.shape
    P, _, K, _ = w.shape
    if padding:
        x = jnp.pad(x, ((0, 0), (0, 0), (padding, padding), (padding, padding)))
        H, W = H + 2 * padding, W + 2 * padding
    Ho, Wo = H - K + 1, W - K + 1

    M = N * Ho * Wo
    CKK = C * K * K
    TM = block_m
    M_pad = ((M + TM - 1) // TM) * TM
    grid_m = M_pad // TM

    # --- glue: im2col in bf16 (MXU input dtype), UNPADDED CKK columns (contiguous rows
    #     in HBM, so the (TM, CKK) block DMA is one contiguous burst) ---
    xb = x.astype(jnp.bfloat16)
    taps = [xb[:, :, kh:kh + Ho, kw:kw + Wo] for kh in range(K) for kw in range(K)]
    patches = jnp.stack(taps, axis=2)                        # (N, C, K*K, Ho, Wo)
    patches = patches.transpose(0, 3, 4, 1, 2).reshape(M, CKK)
    patches = jnp.pad(patches, ((0, M_pad - M), (0, 0)))     # zero rows -> zero stats

    w_mat = w.reshape(P, CKK).T.astype(jnp.bfloat16)         # (CKK, P), unpadded

    # Explicit limit: v5e's default scoped VMEM is only 16 MiB; safe on v7x's 64 MiB.
    vmem_limit = 32 * 1024 * 1024

    patches_spec = pl.BlockSpec((TM, CKK), lambda i: (i, 0))
    w_spec = pl.BlockSpec((CKK, P), lambda i: (0, 0))        # tiny, stays resident
    # TODO(synk): for realistic C*K*K / P > 128, add a k grid axis over CKK and a
    # 256-lane N tile so a single weight/patch block need not hold the whole
    # contraction (rec #8); irrelevant at these toy sizes while HBM-bound.

    # ---------------- pass 1: per-tile channel statistics (fully parallel) -----------
    flops1 = 2 * M_pad * CKK * P + 3 * M_pad * P
    bytes1 = M_pad * CKK * 2 + CKK * P * 2 + 2 * grid_m * P * 4
    psum, psq = pl.pallas_call(
        _conv_stats_kernel,
        grid=(grid_m,),
        in_specs=[patches_spec, w_spec],
        out_specs=(
            pl.BlockSpec((1, 1, P), lambda i: (i, 0, 0)),
            pl.BlockSpec((1, 1, P), lambda i: (i, 0, 0)),
        ),
        out_shape=(
            jax.ShapeDtypeStruct((grid_m, 1, P), jnp.float32),
            jax.ShapeDtypeStruct((grid_m, 1, P), jnp.float32),
        ),
        compiler_params=pltpu.CompilerParams(
            dimension_semantics=("parallel",),               # shards across TCs (v7x)
            vmem_limit_bytes=vmem_limit),
        cost_estimate=pl.CostEstimate(
            flops=flops1, transcendentals=0, bytes_accessed=bytes1),
    )(patches, w_mat)

    # --- tiny f32 epilogue: reduce partials, fold BN into one scale/shift row --------
    m_true = jnp.float32(M)                                   # true M (pad rows are zero)
    ch_sum = jnp.sum(psum[:, 0, :], axis=0, keepdims=True)    # (1, P)
    ch_sq = jnp.sum(psq[:, 0, :], axis=0, keepdims=True)
    mean = ch_sum / m_true
    var = jnp.maximum(ch_sq / m_true - mean * mean, 0.0)      # clamp cancellation residue
    inv_std = lax.rsqrt(var + jnp.float32(_EPS))
    scale = gamma.astype(jnp.float32).reshape(1, P) * inv_std
    shift = beta.astype(jnp.float32).reshape(1, P) - mean * scale

    # ---------------- pass 2: recompute conv, fused BN + ReLU (fully parallel) -------
    flops2 = 2 * M_pad * CKK * P + 2 * M_pad * P
    bytes2 = M_pad * CKK * 2 + CKK * P * 2 + 2 * P * 4 + M_pad * P * 4
    out_full = pl.pallas_call(
        _conv_bn_relu_kernel,
        grid=(grid_m,),
        in_specs=[
            patches_spec,
            w_spec,
            pl.BlockSpec((1, P), lambda i: (0, 0)),
            pl.BlockSpec((1, P), lambda i: (0, 0)),
        ],
        out_specs=pl.BlockSpec((TM, P), lambda i: (i, 0)),
        out_shape=jax.ShapeDtypeStruct((M_pad, P), jnp.float32),
        compiler_params=pltpu.CompilerParams(
            dimension_semantics=("parallel",),
            vmem_limit_bytes=vmem_limit),
        cost_estimate=pl.CostEstimate(
            flops=flops2, transcendentals=0, bytes_accessed=bytes2),
    )(patches, w_mat, scale, shift)

    # NHWC/(M, P) is the kernel-native layout; the transpose below exists only for
    # NCHW module parity and now moves just M*P*4 unpadded bytes (rec #5: NHWC
    # consumers should take out_full[:M] directly).
    out = out_full[:M].reshape(N, Ho, Wo, P).transpose(0, 3, 1, 2)
    return out


def _reference(x, w, b, gamma, beta):
    conv = lax.conv_general_dilated(
        x, w, window_strides=(1, 1), padding="VALID",
        dimension_numbers=("NCHW", "OIHW", "NCHW")) + b[None, :, None, None]
    mean = conv.mean(axis=(0, 2, 3), keepdims=True)
    var = ((conv - mean) ** 2).mean(axis=(0, 2, 3), keepdims=True)
    normed = (conv - mean) * lax.rsqrt(var + _EPS)
    normed = normed * gamma[None, :, None, None] + beta[None, :, None, None]
    return jnp.maximum(normed, 0.0)


if __name__ == "__main__":
    # small shapes consistent with the module
    N, C, H, W = 2, 4, 16, 16
    P, K = 8, 3

    key = jax.random.PRNGKey(0)
    kx, kw_key, kb_key, kg_key, kbe_key = jax.random.split(key, 5)
    x = jax.random.normal(kx, (N, C, H, W), dtype=jnp.float32)
    w = jax.random.normal(kw_key, (P, C, K, K), dtype=jnp.float32) * 0.1
    b = jax.random.normal(kb_key, (P,), dtype=jnp.float32) * 0.1
    gamma = 1.0 + 0.1 * jax.random.normal(kg_key, (P,), dtype=jnp.float32)
    beta = 0.1 * jax.random.normal(kbe_key, (P,), dtype=jnp.float32)

    # block_m=128 so the toy M=392 (padded to 512) exercises a multi-tile grid and the
    # partial-stats reduction; keep the 2048 default for realistic sizes.
    out = convblock_forward(x, w, b, gamma, beta, block_m=128)
    jax.block_until_ready(out)

    ref = _reference(x, w, b, gamma, beta)
    assert out.shape == ref.shape == (N, P, H - K + 1, W - K + 1)
    # bf16 MXU inputs (f32 accumulation / f32 BN math) vs a pure-f32 reference:
    # tolerance loosened accordingly.
    assert jnp.allclose(out, ref, atol=5e-2, rtol=5e-2), "mismatch vs reference"

    print("KERNEL_OK")
</pallas_src>

<mosaic_0001>
module attributes {stable_mosaic.version = 11 : i64} {
  func.func @_conv_stats_kernel(%arg0: i32, %arg1: memref<128x36xbf16, #tpu.memory_space<vmem>>, %arg2: memref<36x8xbf16, #tpu.memory_space<vmem>>, %arg3: memref<1x1x8xf32, #tpu.memory_space<vmem>>, %arg4: memref<1x1x8xf32, #tpu.memory_space<vmem>>) attributes {dimension_semantics = [#tpu.dimension_semantics<parallel>], iteration_bounds = array<i64: 4>, scalar_prefetch = 0 : i64, scratch_operands = 0 : i64, tpu.core_type = #tpu.core_type<tc>, window_params = [{transform_indices = @transform_0, window_bounds = array<i64: 128, 36>}, {pipeline_mode = #tpu.pipeline_mode<synchronous>, transform_indices = @transform_1, window_bounds = array<i64: 36, 8>}, {transform_indices = @transform_2, window_bounds = array<i64: 1, 1, 8>}, {transform_indices = @transform_3, window_bounds = array<i64: 1, 1, 8>}]} {
    %c0 = arith.constant 0 : index
    %c0_0 = arith.constant 0 : index
    %0 = vector.load %arg1[%c0, %c0_0] : memref<128x36xbf16, #tpu.memory_space<vmem>>, vector<128x36xbf16>
    %c0_1 = arith.constant 0 : index
    %c0_2 = arith.constant 0 : index
    %1 = vector.load %arg2[%c0_1, %c0_2] : memref<36x8xbf16, #tpu.memory_space<vmem>>, vector<36x8xbf16>
    %cst = arith.constant dense<0.000000e+00> : vector<128x8xf32>
    %2 = tpu.matmul %0, %1, %cst {dimension_numbers = #tpu.dot_dimension_numbers<[1], [0], [0], [1], [0, 0, 1, 1], [], []>} : vector<128x36xbf16>, vector<36x8xbf16>, vector<128x8xf32> -> vector<128x8xf32>
    %cst_3 = arith.constant dense<0.000000e+00> : vector<8xf32>
    %3 = vector.multi_reduction <add>, %2, %cst_3 [0] : vector<128x8xf32> to vector<8xf32>
    %4 = vector.shape_cast %3 : vector<8xf32> to vector<1x8xf32>
    %5 = vector.shape_cast %4 : vector<1x8xf32> to vector<1x1x8xf32>
    %c0_4 = arith.constant 0 : index
    %c0_5 = arith.constant 0 : index
    %c0_6 = arith.constant 0 : index
    %6 = vector.load %arg3[%c0_4, %c0_5, %c0_6] : memref<1x1x8xf32, #tpu.memory_space<vmem>>, vector<1x1x8xf32>
    tpu.vector_store %arg3[%c0_4, %c0_5, %c0_6], %5 {strides = array<i32>} : memref<1x1x8xf32, #tpu.memory_space<vmem>>, vector<1x1x8xf32>,
    %7 = arith.mulf %2, %2 : vector<128x8xf32>
    %cst_7 = arith.constant dense<0.000000e+00> : vector<8xf32>
    %8 = vector.multi_reduction <add>, %7, %cst_7 [0] : vector<128x8xf32> to vector<8xf32>
    %9 = vector.shape_cast %8 : vector<8xf32> to vector<1x8xf32>
    %10 = vector.shape_cast %9 : vector<1x8xf32> to vector<1x1x8xf32>
    %c0_8 = arith.constant 0 : index
    %c0_9 = arith.constant 0 : index
    %c0_10 = arith.constant 0 : index
    %11 = vector.load %arg4[%c0_8, %c0_9, %c0_10] : memref<1x1x8xf32, #tpu.memory_space<vmem>>, vector<1x1x8xf32>
    tpu.vector_store %arg4[%c0_8, %c0_9, %c0_10], %10 {strides = array<i32>} : memref<1x1x8xf32, #tpu.memory_space<vmem>>, vector<1x1x8xf32>,
    return
  }
  func.func @transform_0(%arg0: i32) -> (i32, i32) {
    %c0_i32 = arith.constant 0 : i32
    %c0_i32_0 = arith.constant 0 : i32
    return %arg0, %c0_i32 : i32, i32
  }
  func.func @transform_1(%arg0: i32) -> (i32, i32) {
    %c0_i32 = arith.constant 0 : i32
    %c0_i32_0 = arith.constant 0 : i32
    %c0_i32_1 = arith.constant 0 : i32
    return %c0_i32, %c0_i32_0 : i32, i32
  }
  func.func @transform_2(%arg0: i32) -> (i32, i32, i32) {
    %c0_i32 = arith.constant 0 : i32
    %c0_i32_0 = arith.constant 0 : i32
    %c0_i32_1 = arith.constant 0 : i32
    return %arg0, %c0_i32, %c0_i32_0 : i32, i32, i32
  }
  func.func @transform_3(%arg0: i32) -> (i32, i32, i32) {
    %c0_i32 = arith.constant 0 : i32
    %c0_i32_0 = arith.constant 0 : i32
    %c0_i32_1 = arith.constant 0 : i32
    return %arg0, %c0_i32, %c0_i32_0 : i32, i32, i32
  }
}

</mosaic_0001>

<bundles_post_ra>
// kernel: tpu_custom_call.1
= control target key start
LH: loop header
LB: loop body
LE: loop exit
PB: predicated region body
PF: predicated region fallthrough
CT: control target
= control target key end

     0   :  { %9 = vsyncpa [#allocation3], 0  ;;  %s1027_s0 = inlined_call_operand.vmem [shape: bf16[512,36], index: 0, kind: input, shape index: {}]   ;;  %s1028_s1 = inlined_call_operand.vmem [shape: bf16[36,8], index: 1, kind: input, shape index: {}]   ;;  %s1029_s2 = inlined_call_operand.hbm [shape: f32[4,1,8], index: 2, kind: output, shape index: {0}]   ;;  %s1030_s3 = inlined_call_operand.hbm [shape: f32[4,1,8], index: 3, kind: output, shape index: {1}]  }
   0x1   :  { %11 = vsyncpa [#allocation3 + $0x1], 0 }
   0x2   :  { %12 = vsyncpa [#allocation5], 0 }
   0x3   :  { %14 = vsyncpa [#allocation5 + $0x1], 0  ;;  %s833_s12 = smov 0   ;;  %s835_s13 = smov 0  }
   0x4   :  { %s837_s14 = smov 0   ;;  %s839_s15 = smov 0  }
   0x5 LB: > { %s589_s16 = sadd.s32 4294967295, %s809_s15   ;;  %s590_s17 = sadd.s32 4294967294, %s809_s15   ;;  %s809_s15 = sphi %s839_s15, %s1036_s15   ;;  %s805_s14 = sphi %s837_s14, %s1035_s14   ;;  %s801_s13 = sphi %s835_s13, %s1034_s13   ;;  %s797_s12 = sphi %s833_s12, %s1033_s12  }
   0x6   : > { %s856_s18 = sadd.s32 1, %s809_s15   ;;  %s74_s19 = sadd.s32 1, %s805_s14 }
   0x7   : > { %s71_s20 = ssub.s32 %s809_s15, %s856_s18  ;;  %p84_p0 = scmp.ne.s32.totalorder %s805_s14, %s801_s13 }
   0x8   : > { %p72_p1 = scmp.eq.s32.totalorder %s71_s20, 0  ;;  %p85_p2 = scmp.eq.s32.totalorder %s589_s16, 3 }
   0x9   : > { %p90_p3 = scmp.ne.s32.totalorder %s801_s13, %s797_s12  ;;  %p91_p4 = scmp.eq.s32.totalorder %s590_s17, 3 }
   0xa   : > { %s866_s21 = scalar_select %p72_p1, %s805_s14, %s74_s19  }
   0xb   : > { %p868_p5 = por %p85_p2, %p84_p0  ;;  %p872_p6 = por %p91_p4, %p90_p3 }
   0xc   : > { %p593_p7 = scmp.ge.s32.totalorder %s809_s15, 1  ;;  %p147_p8 = scmp.lt.s32.totalorder %s809_s15, 5 }
   0xe   : > { %p148_p9 = pnand %p593_p7, %p147_p8 }
   0xf   : > { %v704_v0 = vld [vmem:[%s1028_s1] sm:$0xff] (!%p148_p9)   ;;  %v705_v1 = vld [vmem:[%s1028_s1 + $0x8] sm:$0xff] (!%p148_p9)   ;;  %s884_s28 = sshll.u32 (!%p148_p9), %s589_s16, 4  ;;  %v706_v2 = vld [vmem:[%s1028_s1 + $0x10] ss:$0 sps:$4 sm:$0x33] (!%p148_p9)  }
  0x10   : > { %151 = sbr.rel (%p148_p9) target bundleno = 324 (0x144), region = 28  ;;  %630 = vmatprep.subr.bf16.mxu0 (!%p148_p9), %v704_v0  ;;  %p175_p10 = scmp.lt.s32.totalorder (!%p148_p9), %s884_s28, 63  ;;  %652 = vmatprep.subr.bf16.mxu1 (!%p148_p9), %v704_v0  ;;  %vm282_vm0 = vcmask (!%p148_p9), 1041408   ;;  %vm257_vm1 = vcmask (!%p148_p9), 293888   ;;  %vm383_vm2 = vcmask (!%p148_p9), 64512   ;;  %vm421_vm3 = vcmask (!%p148_p9), 57344  }
  0x11   : > { %631 = vmatpush3.bf16.msra.mxu0 (!%p148_p9), %v704_v0  ;;  %655 = vmatpush3.bf16.msra.mxu1 (!%p148_p9), %v704_v0  ;;  %v284_v3 = vsel (!%p148_p9), %vm282_vm0, %v706_v2, 0  ;;  %s940_s9 = sand.u32 (!%p148_p9), 1, %s801_s13   ;;  %s950_s24 = scalar_lea.hbm (!%p148_p9), %s1029_s2, %s884_s28 }
  0x12   : > { %632 = vmatprep.subr.bf16.mxu0 (!%p148_p9), %v705_v1  ;;  %653 = vmatprep.subr.bf16.mxu1 (!%p148_p9), %v705_v1  ;;  %s167_s10 = scalar_lea.vmem (!%p148_p9), [#allocation2], %s940_s9  ;;  %s173_s16 = scalar_lea.vmem (!%p148_p9), [#allocation4], %s940_s9 }
  0x13   : > { %s494_s11 = sshll.u32 (!%p148_p9), %s167_s10, 4  ;;  %s507_s17 = sshll.u32 (!%p148_p9), %s173_s16, 4  ;;  %s952_s11 = int_to_ptr.vmem [resolvable:$true] %s494_s11  ;;  %s961_s17 = int_to_ptr.vmem [resolvable:$true] %s507_s17 }
  0x14   : > { %s959_s27 = scalar_lea.hbm (!%p148_p9), %s1030_s3, %s884_s28  ;;  %s478_s29 = scalar_lea.sflag (!%p148_p9), [#allocation3], %s940_s9 }
  0x15   : > { %633 = vmatpush3.bf16.msra.mxu0 (!%p148_p9), %v705_v1  ;;  %656 = vmatpush3.bf16.msra.mxu1 (!%p148_p9), %v705_v1  ;;  %s715_s30 = scalar_lea.vmem (!%p148_p9), %s952_s11, 16 }
  0x16   : > { %658 = vmatprep.subr.msk.bf16.mxu0 (!%p148_p9), %vm282_vm0, %v706_v2  ;;  %659 = vmatprep.subr.msk.bf16.mxu1 (!%p148_p9), %vm282_vm0, %v706_v2  ;;  %p716_p11 = scmp.ne.s32.totalorder (!%p148_p9), %s952_s11, %s715_s30 }
  0x17   : > { %s176_s4 = scalar_select %p175_p10, %s884_s28, 63 }
  0x18   : > { %p717_p12 = pnand %p716_p11, %p868_p5 }
  0x19   : > { %s595_s5 = sshll.u32 %s176_s4, 2  ;;  %635 = vmatpush3.bf16.msra.mxu0 %v284_v3  ;;  %657 = vmatpush3.bf16.msra.mxu1 %v284_v3  ;;  %s811_s4 = smov [#allocation2]  }
  0x1a   : > { %s178_s8 = scalar_lea.vmem %s1027_s0, %s595_s5  ;;  %p718_p13 = pneg %p717_p12 }
  0x1b   : > { %v707_v4 = vld [vmem:[%s178_s8] sm:$0xff]   ;;  %v708_v5 = vld [vmem:[%s178_s8 + $0x8] sm:$0xff]   ;;  %v709_v6 = vld [vmem:[%s178_s8 + $0x10] sm:$0xff]   ;;  %s719_s5 = sshll.u32 %s811_s4, 4  ;;  %s720_s5 = int_to_ptr.vmem [resolvable:$false] %s719_s5 }
  0x1c   : > { %636 = vmatprep.mubr.msk.bf16.mxu0 %vm257_vm1, %v707_v4  ;;  %v711_v7 = vld [vmem:[%s178_s8 + $0x20] sm:$0xff]   ;;  %v712_v8 = vld [vmem:[%s178_s8 + $0x28] sm:$0xff]   ;;  %v713_v9 = vld [vmem:[%s178_s8 + $0x30] sm:$0xff]   ;;  %s721_s6 = scalar_lea.vmem %s720_s5, 32  ;;  %p722_p0 = scmp.lt.s32.totalorder %s952_s11, %s720_s5 }
  0x1d   : > { %637 = vmatmul.mubr.msk.bf16.vlgmr.msra.gmra.mrb[0].mxu0 %vm257_vm1, %v708_v5  ;;  %644 = vmatprep.mubr.msk.bf16.mxu1 %vm257_vm1, %v711_v7  ;;  %v710_v10 = vld [vmem:[%s178_s8 + $0x18] sm:$0xff]   ;;  %p723_p1 = scmp.lt.s32.totalorder %s721_s6, %s715_s30 }
  0x1e   : > { %640 = vmatprep.mubr.msk.bf16.mxu0 %vm257_vm1, %v709_v6  ;;  %645 = vmatmul.mubr.msk.bf16.vlgmr.msra.gmra.mrb[0].mxu1 %vm257_vm1, %v712_v8  ;;  %v714_v11 = vld [vmem:[%s178_s8 + $0x38] sm:$0xff]  }
  0x1f   : > { %648 = vmatprep.mubr.msk.bf16.mxu1 %vm257_vm1, %v713_v9  ;;  %p724_p2 = por %p723_p1, %p722_p0 }
  0x21   : > { %p725_p3 = pnand %p724_p2, %p718_p13 }
  0x25   : > { %641 = vmatmul.mubr.msk.bf16.gmra.mrb[4].mxu0 %vm257_vm1, %v710_v10 }
  0x26   : > { %649 = vmatmul.mubr.msk.bf16.gmra.mrb[4].mxu1 %vm257_vm1, %v714_v11 }
  0xf0   : > { %v638_v12 = vpop.f32.mrb[0].mxu0 }
  0xf1   : > { %v320_v13 = vpop.f32.mrb[1].mxu0  ;;  %v646_v14 = vpop.f32.mrb[0].mxu1  ;;  %v425_v20 = vmul.f32 %v638_v12, %v638_v12  ;;  %v387_v26 = vsel %vm383_vm2, %v638_v12, 0.0 }
  0xf2   : > { %v423_v15 = vmul.f32 %v320_v13, %v320_v13  ;;  %v639_v16 = vpop.f32.mrb[2].mxu0  ;;  %v352_v17 = vpop.f32.mrb[1].mxu1  ;;  %v384_v21 = vsel %vm383_vm2, %v320_v13, 0.0  ;;  %v433_v7 = vmul.f32 %v646_v14, %v646_v14  ;;  %v403_v11 = vsel %vm383_vm2, %v646_v14, 0.0 }
  0xf3   : > { %v323_v18 = vpop.f32.mrb[3].mxu0  ;;  %v902_v19 = vpop.f32.mrb[2].mxu1  ;;  %v426_v28 = vmul.f32 %v639_v16, %v639_v16  ;;  %v442_v32 = vsel %vm383_vm2, %v425_v20, 0.0  ;;  %v389_v33 = vsel %vm383_vm2, %v639_v16, 0.0  ;;  %v431_v58 = vmul.f32 %v352_v17, %v352_v17 }
  0xf4   : > { %v385_v22 = vsel %vm383_vm2, %v323_v18, 0.0  ;;  %v424_v23 = vmul.f32 %v323_v18, %v323_v18  ;;  %v355_v24 = vpop.f32.mrb[3].mxu1  ;;  %v439_v27 = vsel %vm383_vm2, %v423_v15, 0.0  ;;  %v399_v63 = vsel %vm383_vm2, %v352_v17, 0.0 }
  0xf5   : > { %v386_v25 = vadd.f32 %v385_v22, %v384_v21  ;;  %v444_v39 = vsel %vm383_vm2, %v426_v28, 0.0  ;;  %v454_v3 = vsel %vm383_vm2, %v431_v58, 0.0  ;;  %v432_v4 = vmul.f32 %v355_v24, %v355_v24 }
  0xf6   : > { %v440_v29 = vsel %vm383_vm2, %v424_v23, 0.0  ;;  %v401_v8 = vsel %vm383_vm2, %v355_v24, 0.0  ;;  %v434_v12 = vmul.f32 %v902_v19, %v902_v19  ;;  %v458_v18 = vsel %vm383_vm2, %v433_v7, 0.0 }
  0xf7   : > { %v388_v30 = vadd.f32 %v387_v26, %v386_v25  ;;  %v441_v31 = vadd.f32 %v440_v29, %v439_v27  ;;  %v456_v13 = vsel %vm383_vm2, %v432_v4, 0.0  ;;  %v405_v20 = vsel %vm383_vm2, %v902_v19, 0.0 }
  0xf8   : > { %v642_v34 = vpop.f32.mrb[4].mxu0  ;;  %v460_v24 = vsel %vm383_vm2, %v434_v12, 0.0 }
  0xf9   : > { %v443_v35 = vadd.f32 %v442_v32, %v441_v31  ;;  %v336_v36 = vpop.f32.mrb[5].mxu0  ;;  %v390_v37 = vadd.f32 %v389_v33, %v388_v30  ;;  %v650_v38 = vpop.f32.mrb[4].mxu1  ;;  %v429_v48 = vmul.f32 %v642_v34, %v642_v34  ;;  %v395_v55 = vsel %vm383_vm2, %v642_v34, 0.0 }
  0xfa   : > { %v391_v40 = vsel %vm383_vm2, %v336_v36, 0.0  ;;  %v427_v41 = vmul.f32 %v336_v36, %v336_v36  ;;  %v643_v42 = vpop.f32.mrb[6].mxu0  ;;  %v368_v43 = vpop.f32.mrb[5].mxu1  ;;  %v437_v28 = vmul.f32 %v650_v38, %v650_v38  ;;  %v411_v32 = vsel %vm383_vm2, %v650_v38, 0.0 }
  0xfb   : > { %v392_v44 = vadd.f32 %v391_v40, %v390_v37  ;;  %v445_v45 = vadd.f32 %v444_v39, %v443_v35  ;;  %v339_v46 = vpop.f32.mrb[7].mxu0  ;;  %v651_v47 = vpop.f32.mrb[6].mxu1  ;;  %v430_v56 = vmul.f32 %v643_v42, %v643_v42  ;;  %v450_v61 = vsel %vm383_vm2, %v429_v48, 0.0 }
  0xfc   : > { %v446_v49 = vsel %vm383_vm2, %v427_v41, 0.0  ;;  %v393_v50 = vsel %vm383_vm2, %v339_v46, 0.0  ;;  %v428_v51 = vmul.f32 %v339_v46, %v339_v46  ;;  %v371_v52 = vpop.f32.mrb[7].mxu1  ;;  %v397_v62 = vsel %vm383_vm2, %v643_v42, 0.0 }
  0xfd   : > { %v447_v53 = vadd.f32 %v446_v49, %v445_v45  ;;  %v394_v54 = vadd.f32 %v393_v50, %v392_v44  ;;  %v452_v2 = vsel %vm383_vm2, %v430_v56, 0.0  ;;  %v435_v15 = vmul.f32 %v368_v43, %v368_v43 }
  0xfe   : > { %v448_v57 = vsel %vm383_vm2, %v428_v51, 0.0  ;;  %v407_v21 = vsel %vm383_vm2, %v368_v43, 0.0  ;;  %v436_v25 = vmul.f32 %v371_v52, %v371_v52  ;;  %v409_v29 = vsel %vm383_vm2, %v371_v52, 0.0 }
  0xff   : > { %v396_v59 = vadd.f32 %v395_v55, %v394_v54  ;;  %v449_v60 = vadd.f32 %v448_v57, %v447_v53  ;;  %v462_v14 = vsel %vm383_vm2, %v435_v15, 0.0  ;;  %v438_v19 = vmul.f32 %v651_v47, %v651_v47 }
 0x100   : > { %v464_v33 = vsel %vm383_vm2, %v436_v25, 0.0  ;;  %v466_v36 = vsel %vm383_vm2, %v437_v28, 0.0  ;;  %v413_v37 = vsel %vm383_vm2, %v651_v47, 0.0 }
 0x101   : > { %v451_v0 = vadd.f32 %v450_v61, %v449_v60  ;;  %v398_v1 = vadd.f32 %v397_v62, %v396_v59  ;;  %v468_v41 = vsel %vm383_vm2, %v438_v19, 0.0 }
 0x103   : > { %v400_v5 = vadd.f32 %v399_v63, %v398_v1  ;;  %v453_v6 = vadd.f32 %v452_v2, %v451_v0 }
 0x105   : > { %v455_v9 = vadd.f32 %v454_v3, %v453_v6  ;;  %v402_v10 = vadd.f32 %v401_v8, %v400_v5 }
 0x107   : > { %v404_v16 = vadd.f32 %v403_v11, %v402_v10  ;;  %v457_v17 = vadd.f32 %v456_v13, %v455_v9 }
 0x109   : > { %v459_v22 = vadd.f32 %v458_v18, %v457_v17  ;;  %v406_v23 = vadd.f32 %v405_v20, %v404_v16 }
 0x10b   : > { %v408_v26 = vadd.f32 %v407_v21, %v406_v23  ;;  %v461_v27 = vadd.f32 %v460_v24, %v459_v22 }
 0x10d   : > { %v463_v30 = vadd.f32 %v462_v14, %v461_v27  ;;  %v410_v31 = vadd.f32 %v409_v29, %v408_v26 }
 0x10f   : > { %v412_v34 = vadd.f32 %v411_v32, %v410_v31  ;;  %v465_v35 = vadd.f32 %v464_v33, %v463_v30 }
 0x111   : > { %v414_v39 = vadd.f32 %v413_v37, %v412_v34  ;;  %v467_v40 = vadd.f32 %v466_v36, %v465_v35 }
 0x113   : > { %v415_v42 = vrot.slane %v414_v39, 4  ;;  %v469_v43 = vadd.f32 %v468_v41, %v467_v40 }
 0x115   : > { %v416_v38 = vadd.f32 %v415_v42, %v414_v39  ;;  %v470_v44 = vrot.slane %v469_v43, 4 }
 0x117   : > { %v417_v45 = vrot.slane %v416_v38, 2  ;;  %v471_v46 = vadd.f32 %v470_v44, %v469_v43 }
 0x119   : > { %v418_v48 = vadd.f32 %v417_v45, %v416_v38  ;;  %v472_v49 = vrot.slane %v471_v46, 2 }
 0x11b   : > { %v419_v47 = vrot.slane %v418_v48, 1  ;;  %v473_v50 = vadd.f32 %v472_v49, %v471_v46 }
 0x11d   : > { %v420_v51 = vadd.f32 %v419_v47, %v418_v48  ;;  %v474_v52 = vrot.slane %v473_v50, 1 }
 0x11f   : > { %422 = vst.msk [vmem:[%s167_s10] sm:$0x1] %vm421_vm3, %v420_v51  ;;  %v475_v53 = vadd.f32 %v474_v52, %v473_v50 }
 0x120   : > { %728 = shalt.err (!%p725_p3)
}
 0x121   : > { %s729_s28 = scalar_lea.hbm %s950_s24, 16  ;;  %s733_s10 = scalar_lea.hbm %s1029_s2, 64 }
 0x122   : > { %p730_p4 = scmp.ne.s32.totalorder %s950_s24, %s729_s28  ;;  %p734_p9 = scmp.lt.u32.totalorder %s950_s24, %s1029_s2 }
 0x123   : > { %p735_p10 = scmp.lt.u32.totalorder %s733_s10, %s729_s28  ;;  %p737_p12 = scmp.lt.u32.totalorder %s729_s28, %s950_s24 }
 0x124   : > { %p731_p7 = pnand %p730_p4, %p868_p5 }
 0x125   : > { %p736_p11 = por %p735_p10, %p734_p9 }
 0x126   : > { %p732_p8 = pneg %p731_p7 }
 0x127   : > { %p738_p13 = por %p737_p12, %p736_p11 }
 0x129   : > { %p739_p0 = pnand %p738_p13, %p732_p8 }
 0x12b   : > { %742 = shalt.err (!%p739_p0)
}
 0x12c   : > { %660 = dma.vmem_to_hbm [thread:$0]  (%p868_p5), %s952_s11, 16, %s950_s24, %s478_s29   ;;  %476 = vst.msk [vmem:[%s173_s16] sm:$0x1] %vm421_vm3, %v475_v53 }
 0x12d   : > { %s482_s25 = scalar_lea.sflag [#allocation5], %s940_s9  ;;  %s743_s26 = scalar_lea.vmem %s961_s17, 16 }
 0x12e   : > { %p744_p1 = scmp.ne.s32.totalorder %s961_s17, %s743_s26  ;;  %s812_s30 = smov [#allocation4]  }
 0x12f   : > { %s747_s4 = sshll.u32 %s812_s30, 4  ;;  %s748_s4 = int_to_ptr.vmem [resolvable:$false] %s747_s4 }
 0x130   : > { %p745_p2 = pnand %p744_p1, %p868_p5  ;;  %s749_s5 = scalar_lea.vmem %s748_s4, 32 }
 0x131   : > { %p750_p4 = scmp.lt.s32.totalorder %s961_s17, %s748_s4  ;;  %p751_p7 = scmp.lt.s32.totalorder %s749_s5, %s743_s26 }
 0x132   : > { %p746_p3 = pneg %p745_p2 }
 0x133   : > { %p752_p8 = por %p751_p7, %p750_p4 }
 0x135   : > { %p753_p9 = pnand %p752_p8, %p746_p3 }
 0x137   : > { %756 = shalt.err (!%p753_p9)
}
 0x138   : > { %s757_s9 = scalar_lea.hbm %s959_s27, 16  ;;  %s761_s24 = scalar_lea.hbm %s1030_s3, 64 }
 0x139   : > { %p758_p10 = scmp.ne.s32.totalorder %s959_s27, %s757_s9  ;;  %p762_p13 = scmp.lt.u32.totalorder %s959_s27, %s1030_s3 }
 0x13a   : > { %p763_p0 = scmp.lt.u32.totalorder %s761_s24, %s757_s9  ;;  %p765_p2 = scmp.lt.u32.totalorder %s757_s9, %s959_s27 }
 0x13b   : > { %p759_p11 = pnand %p758_p10, %p868_p5 }
 0x13c   : > { %p764_p1 = por %p763_p0, %p762_p13 }
 0x13d   : > { %p760_p12 = pneg %p759_p11 }
 0x13e   : > { %p766_p3 = por %p765_p2, %p764_p1 }
 0x140   : > { %p767_p4 = pnand %p766_p3, %p760_p12 }
 0x142   : > { %770 = shalt.err (!%p767_p4)
}
 0x143   : > { %661 = dma.vmem_to_hbm [thread:$0]  (%p868_p5), %s961_s17, 16, %s959_s27, %s482_s25  }
 0x144 PF: > { %p671_p7 = scmp.ge.s32.totalorder %s809_s15, 2  ;;  %s519_s28 = sand.u32 1, %s797_s12  }
 0x145   : > { %s520_s7 = scalar_lea.sflag [#allocation3], %s519_s28 }
 0x146   : > { %p665_p8 = pnand %p671_p7, %p872_p6 }
 0x148   : > { %788 = dma.done.wait (!%p665_p8), %s520_s7, 16  }
 0x149   : > { %790 = vsyncadd (!%p665_p8), %s520_s7, 4294967280  ;;  %s528_s8 = scalar_lea.sflag [#allocation5], %s519_s28 }
 0x14a   : > { %792 = dma.done.wait (!%p665_p8), %s528_s8, 16  }
 0x14b   : > { %794 = vsyncadd (!%p665_p8), %s528_s8, 4294967280  ;;  %p17_p5 = scmp.ge.s32.totalorder %s856_s18, 6   ;;  %s1033_s12 = smov %s801_s13 }
 0x14c   : > { %s1034_s13 = smov %s805_s14  ;;  %s1035_s14 = smov %s866_s21 }
 0x14d   : > { %s1036_s15 = smov %s856_s18  ;;  %19 = sbr.rel (!%p17_p5) target bundleno = 5 (0x5), region = 80 }
 0x154   :  { %532 = vsyncpa [#allocation3], 1 }
 0x155   :  { %534 = vsyncpa [#allocation3 + $0x1], 1 }
 0x156   :  { %535 = vsyncpa [#allocation5], 1 }
 0x157   :  { %537 = vsyncpa [#allocation5 + $0x1], 1 }

</bundles_post_ra>
